<compile_context>
chip_gen: v6e
topology: v6e:2x2x1
jax: 0.10.0
libtpu: 0.0.40
codegen_flags: <defaults>
</compile_context>

<pallas_src>
import functools

import jax
import jax.numpy as jnp
from jax.experimental import pallas as pl
from jax.experimental.pallas import tpu as pltpu

# --- model hyperparameters (small, consistent with the module's forward) -------------
C = 2                  # number of ensemble components
D_IN = 10              # input features (branch_input_dim=6 + trunk extras)
HID = 32               # hidden width of each component MLP
D_OUT = 7              # per-component output dim -> total 14 (matches cols 0..13 used
                       # by the production-mode post-processing in the original forward)
D_TOTAL = C * D_OUT
CHID = C * HID
BRANCH_INPUT_DIM = 6   # kept for documentation parity with NeuberNet.__init__


# --- Pallas kernel --------------------------------------------------------------------
def neubernet_kernel(x_ref, w1_ref, b1_ref, w2_ref, b2_ref, out_ref):
    # Normalization is pre-folded into (w1, b1); de-normalization into (w2, b2).
    # All components are fused: one [tm, D_IN] @ [D_IN, C*HID] matmul, tanh, then
    # one [tm, C*HID] @ block-diagonal [C*HID, D_TOTAL] matmul.
    h = jnp.tanh(
        jnp.dot(x_ref[...], w1_ref[...], preferred_element_type=jnp.float32)
        + b1_ref[...]
    )                                                               # [tm, C*HID]
    out_ref[...] = (
        jnp.dot(h, w2_ref[...], preferred_element_type=jnp.float32) + b2_ref[...]
    )                                                               # [tm, D_TOTAL]


# --- parameter folding / fusion (wrapper-side, tiny one-time cost) ---------------------
def _fold_and_fuse_params(params, normalize):
    imean, istd, omean, ostd, w1, b1, w2, b2 = params

    if normalize:
        inv_istd = 1.0 / istd                                        # [1, D_IN]
        # x' = (x - imean) * inv_istd  =>  x' @ W1 + b1 == x @ W1f + b1f
        w1f = w1 * inv_istd.reshape(1, D_IN, 1)                      # [C, D_IN, HID]
        b1f = b1 - jnp.einsum("od,cdh->coh", imean * inv_istd, w1)   # [C, 1, HID]
        # (h @ W2 + b2) * ostd_c + omean_c == h @ W2f + b2f
        ostd_c = ostd[0].reshape(C, 1, D_OUT)
        omean_c = omean[0].reshape(C, 1, D_OUT)
        w2f = w2 * ostd_c                                            # [C, HID, D_OUT]
        b2f = b2 * ostd_c + omean_c                                  # [C, 1, D_OUT]
    else:
        w1f, b1f, w2f, b2f = w1, b1, w2, b2

    # Fuse components: concat W1 along output axis, block-diagonal W2.
    w1_all = jnp.transpose(w1f, (1, 0, 2)).reshape(D_IN, CHID)       # [D_IN, C*HID]
    b1_all = b1f.reshape(1, CHID)                                    # [1, C*HID]
    w2_bd = jnp.zeros((CHID, D_TOTAL), jnp.float32)
    for c in range(C):
        w2_bd = w2_bd.at[c * HID:(c + 1) * HID,
                         c * D_OUT:(c + 1) * D_OUT].set(w2f[c])      # [C*HID, D_TOTAL]
    b2_all = b2f.reshape(1, D_TOTAL)                                 # [1, D_TOTAL]
    return w1_all, b1_all, w2_bd, b2_all


# --- wrapper --------------------------------------------------------------------------
def neubernet_forward(x, params, *, normalize=True, tm=512):
    """x: [B, D_IN] float32.  Returns [B, D_TOTAL] float32."""
    B = x.shape[0]

    # Pick a batch tile: large (amortizes per-step overhead) but no bigger than the
    # 8-aligned batch; pad B up to a multiple of the tile.
    b8 = ((B + 7) // 8) * 8
    tm = max(8, min(tm, b8))
    tm = (tm // 8) * 8
    bp = pl.cdiv(B, tm) * tm
    if bp != B:
        x = jnp.pad(x, ((0, bp - B), (0, 0)))

    w1_all, b1_all, w2_bd, b2_all = _fold_and_fuse_params(params, normalize)

    grid = (bp // tm,)
    cost = pl.CostEstimate(
        flops=2 * bp * (D_IN * CHID + CHID * D_TOTAL),
        transcendentals=bp * CHID,
        bytes_accessed=4 * (bp * (D_IN + D_TOTAL)
                            + D_IN * CHID + CHID + CHID * D_TOTAL + D_TOTAL),
    )

    out = pl.pallas_call(
        neubernet_kernel,
        out_shape=jax.ShapeDtypeStruct((bp, D_TOTAL), jnp.float32),
        grid_spec=pltpu.PrefetchScalarGridSpec(
            num_scalar_prefetch=0,
            grid=grid,
            in_specs=[
                pl.BlockSpec((tm, D_IN), lambda i: (i, 0)),         # x: tiled over batch
                pl.BlockSpec((D_IN, CHID), lambda i: (0, 0)),       # fused W1 (resident)
                pl.BlockSpec((1, CHID), lambda i: (0, 0)),          # fused b1
                pl.BlockSpec((CHID, D_TOTAL), lambda i: (0, 0)),    # block-diag W2
                pl.BlockSpec((1, D_TOTAL), lambda i: (0, 0)),       # fused b2
            ],
            out_specs=pl.BlockSpec((tm, D_TOTAL), lambda i: (i, 0)),
        ),
        compiler_params=pltpu.CompilerParams(
            dimension_semantics=("parallel",),
        ),
        cost_estimate=cost,
    )(x, w1_all, b1_all, w2_bd, b2_all)

    return out[:B]


# --- pure-JAX reference (unfused, matches the PyTorch forward) --------------------------
def neubernet_ref(x, params, *, normalize=True):
    imean, istd, omean, ostd, w1, b1, w2, b2 = params
    if normalize:
        x = (x - imean) / istd
    ys = []
    for c in range(C):
        h = jnp.tanh(x @ w1[c] + b1[c])
        ys.append(h @ w2[c] + b2[c])
    y = jnp.concatenate(ys, axis=-1)
    if normalize:
        y = y * ostd + omean
    return y


# --- deterministic parameter init -------------------------------------------------------
def init_params(key):
    ks = jax.random.split(key, 8)
    input_mean = jax.random.normal(ks[0], (1, D_IN), jnp.float32) * 0.1
    input_std = jnp.abs(jax.random.normal(ks[1], (1, D_IN), jnp.float32)) + 0.5
    output_mean = jax.random.normal(ks[2], (1, D_TOTAL), jnp.float32) * 0.1
    output_std = jnp.abs(jax.random.normal(ks[3], (1, D_TOTAL), jnp.float32)) + 0.5
    w1 = jax.random.normal(ks[4], (C, D_IN, HID), jnp.float32) * (1.0 / jnp.sqrt(D_IN))
    b1 = jax.random.normal(ks[5], (C, 1, HID), jnp.float32) * 0.01
    w2 = jax.random.normal(ks[6], (C, HID, D_OUT), jnp.float32) * (1.0 / jnp.sqrt(HID))
    b2 = jax.random.normal(ks[7], (C, 1, D_OUT), jnp.float32) * 0.01
    return (input_mean, input_std, output_mean, output_std, w1, b1, w2, b2)


if __name__ == "__main__":
    key = jax.random.PRNGKey(0)
    pkey, xkey, xkey2 = jax.random.split(key, 3)
    params = init_params(pkey)

    # normalize=True path (batch a multiple of 8)
    B = 16
    x = jax.random.normal(xkey, (B, D_IN), jnp.float32)
    fwd = jax.jit(functools.partial(neubernet_forward, normalize=True))
    out = jax.block_until_ready(fwd(x, params))
    ref = neubernet_ref(x, params, normalize=True)
    assert out.shape == (B, D_TOTAL)
    assert jnp.allclose(out, ref, atol=1e-4, rtol=1e-4), "Pallas output mismatch (normalize=True)"

    # normalize=False path, ragged batch (exercises wrapper-side padding + slicing)
    B2 = 13
    x2 = jax.random.normal(xkey2, (B2, D_IN), jnp.float32)
    fwd2 = jax.jit(functools.partial(neubernet_forward, normalize=False))
    out2 = jax.block_until_ready(fwd2(x2, params))
    ref2 = neubernet_ref(x2, params, normalize=False)
    assert out2.shape == (B2, D_TOTAL)
    assert jnp.allclose(out2, ref2, atol=1e-4, rtol=1e-4), "Pallas output mismatch (normalize=False)"

    print("KERNEL_OK")
</pallas_src>

<mosaic_0001>
module attributes {stable_mosaic.version = 11 : i64} {
  func.func @neubernet_kernel(%arg0: i32, %arg1: memref<16x10xf32, #tpu.memory_space<vmem>>, %arg2: memref<10x64xf32, #tpu.memory_space<vmem>>, %arg3: memref<1x64xf32, #tpu.memory_space<vmem>>, %arg4: memref<64x14xf32, #tpu.memory_space<vmem>>, %arg5: memref<1x14xf32, #tpu.memory_space<vmem>>, %arg6: memref<16x14xf32, #tpu.memory_space<vmem>>) attributes {dimension_semantics = [#tpu.dimension_semantics<parallel>], iteration_bounds = array<i64: 1>, scalar_prefetch = 0 : i64, scratch_operands = 0 : i64, tpu.core_type = #tpu.core_type<tc>, window_params = [{transform_indices = @transform_0, window_bounds = array<i64: 16, 10>}, {pipeline_mode = #tpu.pipeline_mode<synchronous>, transform_indices = @transform_1, window_bounds = array<i64: 10, 64>}, {pipeline_mode = #tpu.pipeline_mode<synchronous>, transform_indices = @transform_2, window_bounds = array<i64: 1, 64>}, {pipeline_mode = #tpu.pipeline_mode<synchronous>, transform_indices = @transform_3, window_bounds = array<i64: 64, 14>}, {pipeline_mode = #tpu.pipeline_mode<synchronous>, transform_indices = @transform_4, window_bounds = array<i64: 1, 14>}, {transform_indices = @transform_5, window_bounds = array<i64: 16, 14>}]} {
    %c0 = arith.constant 0 : index
    %c0_0 = arith.constant 0 : index
    %0 = vector.load %arg1[%c0, %c0_0] : memref<16x10xf32, #tpu.memory_space<vmem>>, vector<16x10xf32>
    %c0_1 = arith.constant 0 : index
    %c0_2 = arith.constant 0 : index
    %1 = vector.load %arg2[%c0_1, %c0_2] : memref<10x64xf32, #tpu.memory_space<vmem>>, vector<10x64xf32>
    %cst = arith.constant dense<0.000000e+00> : vector<16x64xf32>
    %2 = tpu.matmul %0, %1, %cst {dimension_numbers = #tpu.dot_dimension_numbers<[1], [0], [0], [1], [0, 0, 1, 1], [], []>} : vector<16x10xf32>, vector<10x64xf32>, vector<16x64xf32> -> vector<16x64xf32>
    %c0_3 = arith.constant 0 : index
    %c0_4 = arith.constant 0 : index
    %3 = vector.load %arg3[%c0_3, %c0_4] : memref<1x64xf32, #tpu.memory_space<vmem>>, vector<1x64xf32>
    %4 = vector.broadcast %3 : vector<1x64xf32> to vector<16x64xf32>
    %5 = arith.addf %2, %4 : vector<16x64xf32>
    %6 = math.tanh %5 : vector<16x64xf32>
    %c0_5 = arith.constant 0 : index
    %c0_6 = arith.constant 0 : index
    %7 = vector.load %arg4[%c0_5, %c0_6] : memref<64x14xf32, #tpu.memory_space<vmem>>, vector<64x14xf32>
    %cst_7 = arith.constant dense<0.000000e+00> : vector<16x14xf32>
    %8 = tpu.matmul %6, %7, %cst_7 {dimension_numbers = #tpu.dot_dimension_numbers<[1], [0], [0], [1], [0, 0, 1, 1], [], []>} : vector<16x64xf32>, vector<64x14xf32>, vector<16x14xf32> -> vector<16x14xf32>
    %c0_8 = arith.constant 0 : index
    %c0_9 = arith.constant 0 : index
    %9 = vector.load %arg5[%c0_8, %c0_9] : memref<1x14xf32, #tpu.memory_space<vmem>>, vector<1x14xf32>
    %10 = vector.broadcast %9 : vector<1x14xf32> to vector<16x14xf32>
    %11 = arith.addf %8, %10 : vector<16x14xf32>
    %c0_10 = arith.constant 0 : index
    %c0_11 = arith.constant 0 : index
    %12 = vector.load %arg6[%c0_10, %c0_11] : memref<16x14xf32, #tpu.memory_space<vmem>>, vector<16x14xf32>
    tpu.vector_store %arg6[%c0_10, %c0_11], %11 {strides = array<i32>} : memref<16x14xf32, #tpu.memory_space<vmem>>, vector<16x14xf32>,
    return
  }
  func.func @transform_0(%arg0: i32) -> (i32, i32) {
    %c0_i32 = arith.constant 0 : i32
    %c0_i32_0 = arith.constant 0 : i32
    return %arg0, %c0_i32 : i32, i32
  }
  func.func @transform_1(%arg0: i32) -> (i32, i32) {
    %c0_i32 = arith.constant 0 : i32
    %c0_i32_0 = arith.constant 0 : i32
    %c0_i32_1 = arith.constant 0 : i32
    return %c0_i32, %c0_i32_0 : i32, i32
  }
  func.func @transform_2(%arg0: i32) -> (i32, i32) {
    %c0_i32 = arith.constant 0 : i32
    %c0_i32_0 = arith.constant 0 : i32
    %c0_i32_1 = arith.constant 0 : i32
    return %c0_i32, %c0_i32_0 : i32, i32
  }
  func.func @transform_3(%arg0: i32) -> (i32, i32) {
    %c0_i32 = arith.constant 0 : i32
    %c0_i32_0 = arith.constant 0 : i32
    %c0_i32_1 = arith.constant 0 : i32
    return %c0_i32, %c0_i32_0 : i32, i32
  }
  func.func @transform_4(%arg0: i32) -> (i32, i32) {
    %c0_i32 = arith.constant 0 : i32
    %c0_i32_0 = arith.constant 0 : i32
    %c0_i32_1 = arith.constant 0 : i32
    return %c0_i32, %c0_i32_0 : i32, i32
  }
  func.func @transform_5(%arg0: i32) -> (i32, i32) {
    %c0_i32 = arith.constant 0 : i32
    %c0_i32_0 = arith.constant 0 : i32
    return %arg0, %c0_i32 : i32, i32
  }
}

</mosaic_0001>

<bundles_post_ra>
// kernel: mul.16
= control target key start
LH: loop header
LB: loop body
LE: loop exit
PB: predicated region body
PF: predicated region fallthrough
CT: control target
= control target key end

     0   :  { %vm8_vm0 = vcmask 56320   ;;  %s42_s0 = inlined_call_operand.vmem [shape: f32[14], index: 0, kind: input, shape index: {}]   ;;  %s43_s1 = inlined_call_operand.vmem [shape: f32[2,7], index: 1, kind: output, shape index: {}]  }
   0x1   :  { %v5_v0 = vld [vmem:[%s42_s0] sm:$0x1]  ;;  %s25_s0 = smov 121  }
   0x2   :  { %6 = vst [vmem:[#allocation1] sm:$0x1] %v5_v0 }
   0x9   :  { %v10_v1 = vld [vmem:[#allocation1] sm:$0x1]  }
   0xa   :  { %v7_v2 = vld [vmem:[#allocation1] sm:$0x1]   ;;  %11 = vrot.lane.b32.xlu0 %v10_v1, %s25_s0 }
   0xb   :  { %9 = vst.msk [vmem:[#allocation0] sm:$0x1] %vm8_vm0, %v7_v2  }
  0x7c   :  { %v12_v3 = vpop.permute.xlu0 %11  }
  0x7d   :  { %15 = vst.msk [vmem:[#allocation0 + $0x1] sm:$0x1] %vm8_vm0, %v12_v3  }
  0x84   :  { %v20_v4 = vld [vmem:[#allocation0] sm:$0x3] }
  0x85   :  { %23 = vst [vmem:[%s43_s1] sm:$0x3] %v20_v4 }

// kernel: squeeze.5
= control target key start
LH: loop header
LB: loop body
LE: loop exit
PB: predicated region body
PF: predicated region fallthrough
CT: control target
= control target key end

     0   :  { %vm8_vm0 = vcmask 56320   ;;  %s42_s0 = inlined_call_operand.vmem [shape: f32[14], index: 0, kind: input, shape index: {}]   ;;  %s43_s1 = inlined_call_operand.vmem [shape: f32[2,1,7], index: 1, kind: output, shape index: {}]  }
   0x1   :  { %v5_v0 = vld [vmem:[%s42_s0] sm:$0x1]  ;;  %s25_s0 = smov 121  }
   0x2   :  { %6 = vst [vmem:[#allocation1] sm:$0x1] %v5_v0 }
   0x9   :  { %v10_v1 = vld [vmem:[#allocation1] sm:$0x1]  }
   0xa   :  { %v7_v2 = vld [vmem:[#allocation1] sm:$0x1]   ;;  %11 = vrot.lane.b32.xlu0 %v10_v1, %s25_s0 }
   0xb   :  { %9 = vst.msk [vmem:[#allocation0] sm:$0x1] %vm8_vm0, %v7_v2  }
  0x7c   :  { %v12_v3 = vpop.permute.xlu0 %11  }
  0x7d   :  { %15 = vst.msk [vmem:[#allocation0 + $0x1] sm:$0x1] %vm8_vm0, %v12_v3  }
  0x84   :  { %v20_v4 = vld [vmem:[#allocation0] sm:$0x3] }
  0x85   :  { %23 = vst [vmem:[%s43_s1] sm:$0x3] %v20_v4 }

// kernel: neubernet_forward.1
= control target key start
LH: loop header
LB: loop body
LE: loop exit
PB: predicated region body
PF: predicated region fallthrough
CT: control target
= control target key end

     0   :  { %vm39_vm0 = vcmask 1041408   ;;  %vm32_vm1 = vcmask 80896   ;;  %s390_s0 = inlined_call_operand.vmem [shape: f32[16,10], index: 0, kind: input, shape index: {}]   ;;  %s391_s1 = inlined_call_operand.vmem [shape: f32[10,64], index: 1, kind: input, shape index: {}]   ;;  %s392_s2 = inlined_call_operand.vmem [shape: f32[1,64], index: 2, kind: input, shape index: {}]   ;;  %s393_s3 = inlined_call_operand.vmem [shape: f32[64,14], index: 3, kind: input, shape index: {}]   ;;  %s394_s4 = inlined_call_operand.vmem [shape: f32[1,14], index: 4, kind: input, shape index: {}]   ;;  %s395_s5 = inlined_call_operand.hbm [shape: f32[16,14], index: 5, kind: output, shape index: {}]  }
   0x1   :  { %v24_v0 = vld [vmem:[%s391_s1 + $0x8] sm:$0x3]  ;;  %v23_v1 = vld [vmem:[%s391_s1] sm:$0xff] }
   0x2   :  { %v21_v2 = vld [vmem:[%s390_s0] sm:$0xff]  ;;  %257 = vmatprep.subr.msk.mxu0 %vm39_vm0, %v24_v0 }
   0x3   :  { %261 = vmatprep.mubr.msk.f32.mxu0 %vm32_vm1, %v21_v2 }
   0x4   :  { %10 = vsyncpa [#allocation3], 0  ;;  %258 = vmatpush3.msk.msra.mxu0 %vm39_vm0, %v24_v0  ;;  %v22_v3 = vld [vmem:[%s390_s0 + $0x8] sm:$0xff]  ;;  %v127_v4 = vld [vmem:[%s393_s3 + $0x38] sm:$0xff]  ;;  %vm135_vm2 = vcmask 523264   ;;  %s312_s18 = smov [#allocation2]  }
   0x5   :  { %259 = vmatprep.subr.mxu0 %v23_v1  ;;  %264 = vmatprep.subr.mxu1 %v127_v4  ;;  %v126_v5 = vld [vmem:[%s393_s3 + $0x30] sm:$0xff]  ;;  %v125_v6 = vld [vmem:[%s393_s3 + $0x28] sm:$0xff]  ;;  %v124_v7 = vld [vmem:[%s393_s3 + $0x20] sm:$0xff]  ;;  %s225_s19 = sshll.u32 %s312_s18, 4  ;;  %vm217_vm3 = vcmask 113664   ;;  %s226_s19 = int_to_ptr.vmem [resolvable:$true] %s225_s19 }
   0x6   :  { %260 = vmatpush3.msra.mxu0 %v23_v1  ;;  %265 = vmatpush3.msra.mxu1 %v127_v4  ;;  %v123_v8 = vld [vmem:[%s393_s3 + $0x18] sm:$0xff]  ;;  %v122_v9 = vld [vmem:[%s393_s3 + $0x10] sm:$0xff]  ;;  %v121_v10 = vld [vmem:[%s393_s3 + $0x8] sm:$0xff]  ;;  %p295_p1 = scmp.lt.s32.totalorder %s226_s19, %s226_s19 }
   0x7   :  { %262 = vmatmul.mubr.msk.f32.vlgmr.msra.gmra.mxu0 %vm32_vm1, %v22_v3  ;;  %266 = vmatprep.subr.mxu1 %v126_v5  ;;  %v120_v11 = vld [vmem:[%s393_s3] sm:$0xff] }
   0x8   :  { %267 = vmatpush3.msra.mxu1 %v126_v5  ;;  %v236_v12 = vld [vmem:[%s392_s2] ss:$0 sm:$0xff]  ;;  %s290_s2 = scalar_lea.vmem %s226_s19, 256 }
   0x9   :  { %268 = vmatprep.subr.mxu1 %v125_v6  ;;  %v240_v19 = vld [vmem:[%s394_s4] ss:$0 sm:$0xff]  ;;  %p291_p0 = scmp.ne.s32.totalorder %s226_s19, %s290_s2  ;;  %p296_p2 = scmp.lt.s32.totalorder %s290_s2, %s290_s2 }
   0xa   :  { %269 = vmatpush3.msra.mxu1 %v125_v6 }
   0xb   :  { %270 = vmatprep.subr.mxu1 %v124_v7  ;;  %p297_p3 = por %p296_p2, %p295_p1 }
   0xc   :  { %271 = vmatpush3.msra.mxu1 %v124_v7 }
   0xd   :  { %272 = vmatprep.subr.mxu1 %v123_v8  ;;  %p298_p4 = pnand %p297_p3, %p291_p0 }
   0xe   :  { %273 = vmatpush3.msra.mxu1 %v123_v8 }
   0xf   :  { %274 = vmatprep.subr.mxu1 %v122_v9 }
  0x10   :  { %275 = vmatpush3.msra.mxu1 %v122_v9 }
  0x11   :  { %276 = vmatprep.subr.mxu1 %v121_v10 }
  0x12   :  { %277 = vmatpush3.msra.mxu1 %v121_v10 }
  0x13   :  { %278 = vmatprep.subr.mxu1 %v120_v11 }
  0x14   :  { %279 = vmatpush3.msra.mxu1 %v120_v11 }
  0xc7   :  { %v263_v13 = vpop.f32.mrf.mxu0 }
  0xc8   :  { %v115_v14 = vadd.f32 %v263_v13, %v236_v12 }
  0xc9   :  { %v109_v15 = vpop.f32.mrf.mxu0 }
  0xca   :  { %v110_v16 = vadd.f32 %v236_v12, %v109_v15 }
  0xcc   :  { %286 = vtanh.f32 %v110_v16 }
  0xcd   :  { %288 = vtanh.f32 %v115_v14 }
  0xd9   :  { %v287_v17 = vpop.eup %286 }
  0xda   :  { %v289_v18 = vpop.eup %288  ;;  %280 = vmatprep.mubr.msk.f32.mxu1 %vm135_vm2, %v287_v17 }
  0xdb   :  { %281 = vmatmul.mubr.msk.f32.vlgmr.msra.gmra.mxu1 %vm135_vm2, %v289_v18 }
 0x19b   :  { %v282_v20 = vpop.f32.mrf.mxu1 }
 0x19c   :  { %v214_v21 = vadd.f32 %v282_v20, %v240_v19 }
 0x19d   :  { %v208_v22 = vpop.f32.mrf.mxu1 }
 0x19e   :  { %219 = vst.msk [vmem:[#allocation2 + $0x8] sm:$0xff] %vm217_vm3, %v214_v21  ;;  %v209_v23 = vadd.f32 %v240_v19, %v208_v22 }
 0x1a0   :  { %218 = vst.msk [vmem:[#allocation2] sm:$0xff] %vm217_vm3, %v209_v23 }
 0x1a1   :  { %301 = shalt.err (!%p298_p4)
}
 0x1a2   :  { %s313_s20 = smov 128   ;;  %s314_s21 = smov 8  }
 0x1a3   :  { %231 = dma.vmem_to_hbm [thread:$0]  %s226_s19, 256, %s395_s5, [#allocation3], %s313_s20, %s313_s20, %s314_s21  }
 0x1a4   :  { %310 = dma.done.wait [#allocation3], 256  }
 0x1a5   :  { %311 = vsyncadd [#allocation3], 4294967040 }
 0x1a6   :  { %235 = vsyncpa [#allocation3], 1 }

</bundles_post_ra>
